<compile_context>
chip_gen: v6e
topology: v6e:2x2x1
jax: 0.10.0
libtpu: 0.0.40
codegen_flags: <defaults>
</compile_context>

<pallas_src>
import jax
import jax.numpy as jnp
from jax.experimental import pallas as pl
from jax.experimental.pallas import tpu as pltpu

EPS = 1e-5
LANES = 128
HID = 128  # all hidden layers are zero-padded to this many lanes


def mlp_lm_kernel(x_ref, w1_ref, w2_ref, w3_ref, w4_ref, w5_ref, vec_ref, o_ref):
    # vec layout (f32, (16, vocab_pad)):
    #   rows 0..3 : gamma for bn1..bn4  (zero past the real feature dim)
    #   rows 4..7 : beta  for bn1..bn4  (zero past the real feature dim)
    #   row  8    : fc5 bias, zero-padded to vocab_pad lanes
    vec = vec_ref[...]

    def matmul(h_bf16, w_ref):
        # bf16 MXU operands, f32 accumulation.
        return jnp.dot(h_bf16, w_ref[...], preferred_element_type=jnp.float32)

    def bn_relu(y, layer_idx):
        # BatchNorm1d (training mode) in affine form + ReLU; all elementwise math f32.
        # Fused reduction: one sublane reduce over the lane-concatenated [y | y*y].
        stats = jnp.mean(jnp.concatenate([y, y * y], axis=1), axis=0, keepdims=True)
        mean = stats[:, :HID]
        # Clamp one-pass variance: f32 cancellation can make E[h^2]-E[h]^2 < 0.
        var = jnp.maximum(stats[:, HID:] - mean * mean, 0.0)
        s = vec[layer_idx:layer_idx + 1, :HID] * jax.lax.rsqrt(var + EPS)
        t = vec[4 + layer_idx:5 + layer_idx, :HID] - mean * s
        return jnp.maximum(y * s + t, 0.0)

    h = bn_relu(matmul(x_ref[...], w1_ref), 0)                      # fc1 -> bn1 -> relu
    h = bn_relu(matmul(h.astype(jnp.bfloat16), w2_ref), 1)          # fc2 -> bn2 -> relu
    h = bn_relu(matmul(h.astype(jnp.bfloat16), w3_ref), 2)          # fc3 -> bn3 -> relu
    h = bn_relu(matmul(h.astype(jnp.bfloat16), w4_ref), 3)          # fc4 -> bn4 -> relu
    logits = matmul(h.astype(jnp.bfloat16), w5_ref) + vec[8:9, :]   # fc5 + bias
    o_ref[...] = logits.astype(o_ref.dtype)


def prepare_params(params):
    """One-time packing of model parameters into kernel-ready buffers.

    Call this ONCE at init; the per-call forward does no parameter reshaping,
    padding, or casting."""
    vocab = params["l5"]["w"].shape[1]
    vocab_pad = ((vocab + LANES - 1) // LANES) * LANES  # >= 128

    def pad_w(w, out_pad, in_pad=None):
        d_in, d_out = w.shape
        in_tgt = d_in if in_pad is None else in_pad
        return jnp.pad(w, ((0, in_tgt - d_in), (0, out_pad - d_out))).astype(jnp.bfloat16)

    w1 = pad_w(params["l1"]["w"], HID)             # [input_size, 128]
    w2 = pad_w(params["l2"]["w"], HID, HID)        # [128, 128]
    w3 = pad_w(params["l3"]["w"], HID, HID)        # [128, 128]
    w4 = pad_w(params["l4"]["w"], HID, HID)        # [128, 128]
    w5 = pad_w(params["l5"]["w"], vocab_pad, HID)  # [128, vocab_pad]

    vec = jnp.zeros((16, vocab_pad), jnp.float32)
    for i, l in enumerate(("l1", "l2", "l3", "l4")):
        g = params[l]["gamma"].reshape(-1)
        be = params[l]["beta"].reshape(-1)
        vec = vec.at[i, :g.shape[0]].set(g)
        vec = vec.at[4 + i, :be.shape[0]].set(be)
    vec = vec.at[8, :vocab].set(params["l5"]["b"].reshape(-1))

    return {"weights": (w1, w2, w3, w4, w5), "vec": vec,
            "vocab": vocab, "vocab_pad": vocab_pad}


def mlp_language_model_forward(x, prep):
    """x: [B, char_encoding_len * block_size] (bf16 preferred; f32 cast once).

    Returns PADDED logits [B, vocab_pad] (f32). Keeping the padded slab avoids an
    extra HBM slice per call; slice [:, :prep['vocab']] only if you need exact vocab.
    """
    if x.dtype != jnp.bfloat16:
        x = x.astype(jnp.bfloat16)
    batch = x.shape[0]
    vmem = pl.BlockSpec(memory_space=pltpu.MemorySpace.VMEM)
    return pl.pallas_call(
        mlp_lm_kernel,
        out_shape=jax.ShapeDtypeStruct((batch, prep["vocab_pad"]), jnp.float32),
        in_specs=[vmem] * 7,
        out_specs=vmem,
    )(x, *prep["weights"], prep["vec"])


def init_params(key, vocab_size, hidden_nodes, char_encoding_len, block_size):
    """Synthetic parameters mirroring the PyTorch module shapes.

    Linear weights are stored as [in, out] (i.e. PyTorch W.T). gamma/beta are
    randomized (instead of the trivial 1/0 init) to exercise the affine path."""
    input_size = char_encoding_len * block_size
    h1 = hidden_nodes            # fc1: input_size -> h1
    h2 = hidden_nodes // 2       # fc2: h1 -> h2, fc3: h2 -> h2
    h3 = h2 // 2                 # fc4: h2 -> h3, fc5: h3 -> vocab

    dims = [
        ("l1", input_size, h1, True),
        ("l2", h1, h2, True),
        ("l3", h2, h2, True),
        ("l4", h2, h3, True),
        ("l5", h3, vocab_size, False),
    ]

    params = {}
    for name, d_in, d_out, has_bn in dims:
        key, kw, kb, kg, kbe = jax.random.split(key, 5)
        bound = 1.0 / (d_in ** 0.5)
        w = jax.random.uniform(kw, (d_in, d_out), jnp.float32, -bound, bound)
        b = jax.random.uniform(kb, (1, d_out), jnp.float32, -bound, bound)
        entry = {"w": w, "b": b}
        if has_bn:
            entry["gamma"] = jax.random.uniform(kg, (1, d_out), jnp.float32, 0.5, 1.5)
            entry["beta"] = 0.1 * jax.random.normal(kbe, (1, d_out), jnp.float32)
        params[name] = entry
    return params


def reference_forward(x, params):
    """Pure-JAX reference, faithful to the PyTorch forward (including the pre-BN
    biases, which cancel under training-mode BatchNorm). Uses the same
    bf16-operand / f32-accumulate matmul precision as the kernel so the comparison
    is tight."""
    def dot_bf16(h, w):
        return jnp.dot(h.astype(jnp.bfloat16), w.astype(jnp.bfloat16),
                       preferred_element_type=jnp.float32)

    def bn(h, g, be):
        mean = jnp.mean(h, axis=0, keepdims=True)
        var = jnp.mean((h - mean) ** 2, axis=0, keepdims=True)
        return (h - mean) * jax.lax.rsqrt(var + EPS) * g + be

    h = x
    for layer in ("l1", "l2", "l3", "l4"):
        p = params[layer]
        h = jnp.maximum(bn(dot_bf16(h, p["w"]) + p["b"], p["gamma"], p["beta"]), 0.0)
    p5 = params["l5"]
    return dot_bf16(h, p5["w"]) + p5["b"]


if __name__ == "__main__":
    vocab_size = 32
    hidden_nodes = 64
    char_encoding_len = 4
    block_size = 8
    batch = 32   # >= 16 fills bf16 sublane packing; amortizes fixed dispatch cost

    key = jax.random.PRNGKey(0)
    key, kx = jax.random.split(key)
    params = init_params(key, vocab_size, hidden_nodes, char_encoding_len, block_size)
    prep = prepare_params(params)   # one-time packing (bf16 cast, padding, slab)

    input_size = char_encoding_len * block_size
    x = jax.random.normal(kx, (batch, input_size), jnp.float32).astype(jnp.bfloat16)

    logits_pad = jax.block_until_ready(mlp_language_model_forward(x, prep))
    ref = jax.block_until_ready(reference_forward(x, params))

    assert logits_pad.shape == (batch, prep["vocab_pad"])
    logits = logits_pad[:, :vocab_size]   # test-only slice; consumers can keep padded
    # Tolerance is intentional: bf16 MXU operands + algebraically-equivalent BN
    # rewrite (bias cancellation, clamped one-pass variance).
    assert jnp.allclose(logits, ref, atol=2e-2, rtol=2e-2), "mismatch vs reference"
    # Padded vocab columns must be exactly the (padded-zero) fc5 bias contribution = 0.
    assert jnp.all(logits_pad[:, vocab_size:] == 0.0)

    # TODO(synk): cross-entropy loss branch (targets != None) not implemented in-kernel.
    print("KERNEL_OK")
</pallas_src>

<mosaic_0001>
module attributes {stable_mosaic.version = 11 : i64} {
  func.func @mlp_lm_kernel(%arg0: memref<32x32xbf16, #tpu.memory_space<vmem>>, %arg1: memref<32x128xbf16, #tpu.memory_space<vmem>>, %arg2: memref<128x128xbf16, #tpu.memory_space<vmem>>, %arg3: memref<128x128xbf16, #tpu.memory_space<vmem>>, %arg4: memref<128x128xbf16, #tpu.memory_space<vmem>>, %arg5: memref<128x128xbf16, #tpu.memory_space<vmem>>, %arg6: memref<16x128xf32, #tpu.memory_space<vmem>>, %arg7: memref<32x128xf32, #tpu.memory_space<vmem>>) attributes {dimension_semantics = [], scalar_prefetch = 0 : i64, scratch_operands = 0 : i64, tpu.core_type = #tpu.core_type<tc>} {
    %c0 = arith.constant 0 : index
    %c0_0 = arith.constant 0 : index
    %0 = vector.load %arg6[%c0, %c0_0] : memref<16x128xf32, #tpu.memory_space<vmem>>, vector<16x128xf32>
    %c0_1 = arith.constant 0 : index
    %c0_2 = arith.constant 0 : index
    %1 = vector.load %arg0[%c0_1, %c0_2] : memref<32x32xbf16, #tpu.memory_space<vmem>>, vector<32x32xbf16>
    %c0_3 = arith.constant 0 : index
    %c0_4 = arith.constant 0 : index
    %2 = vector.load %arg1[%c0_3, %c0_4] : memref<32x128xbf16, #tpu.memory_space<vmem>>, vector<32x128xbf16>
    %cst = arith.constant dense<0.000000e+00> : vector<32x128xf32>
    %3 = tpu.matmul %1, %2, %cst {dimension_numbers = #tpu.dot_dimension_numbers<[1], [0], [0], [1], [0, 0, 1, 1], [], []>} : vector<32x32xbf16>, vector<32x128xbf16>, vector<32x128xf32> -> vector<32x128xf32>
    %4 = arith.mulf %3, %3 : vector<32x128xf32>
    %5 = tpu.concatenate %3, %4 in 1 : vector<32x128xf32>, vector<32x128xf32> -> vector<32x256xf32>
    %cst_5 = arith.constant dense<0.000000e+00> : vector<256xf32>
    %6 = vector.multi_reduction <add>, %5, %cst_5 [0] : vector<32x256xf32> to vector<256xf32>
    %7 = vector.shape_cast %6 : vector<256xf32> to vector<1x256xf32>
    %cst_6 = arith.constant 3.200000e+01 : f32
    %8 = vector.broadcast %cst_6 : f32 to vector<1x256xf32>
    %9 = arith.divf %7, %8 : vector<1x256xf32>
    %10 = vector.extract_strided_slice %9 {offsets = [0, 0], sizes = [1, 128], strides = [1, 1]} : vector<1x256xf32> to vector<1x128xf32>
    %11 = vector.extract_strided_slice %9 {offsets = [0, 128], sizes = [1, 128], strides = [1, 1]} : vector<1x256xf32> to vector<1x128xf32>
    %12 = arith.mulf %10, %10 : vector<1x128xf32>
    %13 = arith.subf %11, %12 : vector<1x128xf32>
    %cst_7 = arith.constant 0.000000e+00 : f32
    %14 = vector.broadcast %cst_7 : f32 to vector<1x128xf32>
    %15 = arith.maximumf %13, %14 : vector<1x128xf32>
    %16 = vector.extract_strided_slice %0 {offsets = [0, 0], sizes = [1, 128], strides = [1, 1]} : vector<16x128xf32> to vector<1x128xf32>
    %cst_8 = arith.constant 9.99999974E-6 : f32
    %17 = vector.broadcast %cst_8 : f32 to vector<1x128xf32>
    %18 = arith.addf %15, %17 : vector<1x128xf32>
    %19 = math.rsqrt %18 : vector<1x128xf32>
    %20 = arith.mulf %16, %19 : vector<1x128xf32>
    %21 = vector.extract_strided_slice %0 {offsets = [4, 0], sizes = [1, 128], strides = [1, 1]} : vector<16x128xf32> to vector<1x128xf32>
    %22 = arith.mulf %10, %20 : vector<1x128xf32>
    %23 = arith.subf %21, %22 : vector<1x128xf32>
    %24 = vector.broadcast %20 : vector<1x128xf32> to vector<32x128xf32>
    %25 = arith.mulf %3, %24 : vector<32x128xf32>
    %26 = vector.broadcast %23 : vector<1x128xf32> to vector<32x128xf32>
    %27 = arith.addf %25, %26 : vector<32x128xf32>
    %cst_9 = arith.constant 0.000000e+00 : f32
    %28 = vector.broadcast %cst_9 : f32 to vector<32x128xf32>
    %29 = arith.maximumf %27, %28 : vector<32x128xf32>
    %30 = arith.truncf %29 : vector<32x128xf32> to vector<32x128xbf16>
    %c0_10 = arith.constant 0 : index
    %c0_11 = arith.constant 0 : index
    %31 = vector.load %arg2[%c0_10, %c0_11] : memref<128x128xbf16, #tpu.memory_space<vmem>>, vector<128x128xbf16>
    %cst_12 = arith.constant dense<0.000000e+00> : vector<32x128xf32>
    %32 = tpu.matmul %30, %31, %cst_12 {dimension_numbers = #tpu.dot_dimension_numbers<[1], [0], [0], [1], [0, 0, 1, 1], [], []>} : vector<32x128xbf16>, vector<128x128xbf16>, vector<32x128xf32> -> vector<32x128xf32>
    %33 = arith.mulf %32, %32 : vector<32x128xf32>
    %34 = tpu.concatenate %32, %33 in 1 : vector<32x128xf32>, vector<32x128xf32> -> vector<32x256xf32>
    %cst_13 = arith.constant dense<0.000000e+00> : vector<256xf32>
    %35 = vector.multi_reduction <add>, %34, %cst_13 [0] : vector<32x256xf32> to vector<256xf32>
    %36 = vector.shape_cast %35 : vector<256xf32> to vector<1x256xf32>
    %cst_14 = arith.constant 3.200000e+01 : f32
    %37 = vector.broadcast %cst_14 : f32 to vector<1x256xf32>
    %38 = arith.divf %36, %37 : vector<1x256xf32>
    %39 = vector.extract_strided_slice %38 {offsets = [0, 0], sizes = [1, 128], strides = [1, 1]} : vector<1x256xf32> to vector<1x128xf32>
    %40 = vector.extract_strided_slice %38 {offsets = [0, 128], sizes = [1, 128], strides = [1, 1]} : vector<1x256xf32> to vector<1x128xf32>
    %41 = arith.mulf %39, %39 : vector<1x128xf32>
    %42 = arith.subf %40, %41 : vector<1x128xf32>
    %cst_15 = arith.constant 0.000000e+00 : f32
    %43 = vector.broadcast %cst_15 : f32 to vector<1x128xf32>
    %44 = arith.maximumf %42, %43 : vector<1x128xf32>
    %45 = vector.extract_strided_slice %0 {offsets = [1, 0], sizes = [1, 128], strides = [1, 1]} : vector<16x128xf32> to vector<1x128xf32>
    %cst_16 = arith.constant 9.99999974E-6 : f32
    %46 = vector.broadcast %cst_16 : f32 to vector<1x128xf32>
    %47 = arith.addf %44, %46 : vector<1x128xf32>
    %48 = math.rsqrt %47 : vector<1x128xf32>
    %49 = arith.mulf %45, %48 : vector<1x128xf32>
    %50 = vector.extract_strided_slice %0 {offsets = [5, 0], sizes = [1, 128], strides = [1, 1]} : vector<16x128xf32> to vector<1x128xf32>
    %51 = arith.mulf %39, %49 : vector<1x128xf32>
    %52 = arith.subf %50, %51 : vector<1x128xf32>
    %53 = vector.broadcast %49 : vector<1x128xf32> to vector<32x128xf32>
    %54 = arith.mulf %32, %53 : vector<32x128xf32>
    %55 = vector.broadcast %52 : vector<1x128xf32> to vector<32x128xf32>
    %56 = arith.addf %54, %55 : vector<32x128xf32>
    %cst_17 = arith.constant 0.000000e+00 : f32
    %57 = vector.broadcast %cst_17 : f32 to vector<32x128xf32>
    %58 = arith.maximumf %56, %57 : vector<32x128xf32>
    %59 = arith.truncf %58 : vector<32x128xf32> to vector<32x128xbf16>
    %c0_18 = arith.constant 0 : index
    %c0_19 = arith.constant 0 : index
    %60 = vector.load %arg3[%c0_18, %c0_19] : memref<128x128xbf16, #tpu.memory_space<vmem>>, vector<128x128xbf16>
    %cst_20 = arith.constant dense<0.000000e+00> : vector<32x128xf32>
    %61 = tpu.matmul %59, %60, %cst_20 {dimension_numbers = #tpu.dot_dimension_numbers<[1], [0], [0], [1], [0, 0, 1, 1], [], []>} : vector<32x128xbf16>, vector<128x128xbf16>, vector<32x128xf32> -> vector<32x128xf32>
    %62 = arith.mulf %61, %61 : vector<32x128xf32>
    %63 = tpu.concatenate %61, %62 in 1 : vector<32x128xf32>, vector<32x128xf32> -> vector<32x256xf32>
    %cst_21 = arith.constant dense<0.000000e+00> : vector<256xf32>
    %64 = vector.multi_reduction <add>, %63, %cst_21 [0] : vector<32x256xf32> to vector<256xf32>
    %65 = vector.shape_cast %64 : vector<256xf32> to vector<1x256xf32>
    %cst_22 = arith.constant 3.200000e+01 : f32
    %66 = vector.broadcast %cst_22 : f32 to vector<1x256xf32>
    %67 = arith.divf %65, %66 : vector<1x256xf32>
    %68 = vector.extract_strided_slice %67 {offsets = [0, 0], sizes = [1, 128], strides = [1, 1]} : vector<1x256xf32> to vector<1x128xf32>
    %69 = vector.extract_strided_slice %67 {offsets = [0, 128], sizes = [1, 128], strides = [1, 1]} : vector<1x256xf32> to vector<1x128xf32>
    %70 = arith.mulf %68, %68 : vector<1x128xf32>
    %71 = arith.subf %69, %70 : vector<1x128xf32>
    %cst_23 = arith.constant 0.000000e+00 : f32
    %72 = vector.broadcast %cst_23 : f32 to vector<1x128xf32>
    %73 = arith.maximumf %71, %72 : vector<1x128xf32>
    %74 = vector.extract_strided_slice %0 {offsets = [2, 0], sizes = [1, 128], strides = [1, 1]} : vector<16x128xf32> to vector<1x128xf32>
    %cst_24 = arith.constant 9.99999974E-6 : f32
    %75 = vector.broadcast %cst_24 : f32 to vector<1x128xf32>
    %76 = arith.addf %73, %75 : vector<1x128xf32>
    %77 = math.rsqrt %76 : vector<1x128xf32>
    %78 = arith.mulf %74, %77 : vector<1x128xf32>
    %79 = vector.extract_strided_slice %0 {offsets = [6, 0], sizes = [1, 128], strides = [1, 1]} : vector<16x128xf32> to vector<1x128xf32>
    %80 = arith.mulf %68, %78 : vector<1x128xf32>
    %81 = arith.subf %79, %80 : vector<1x128xf32>
    %82 = vector.broadcast %78 : vector<1x128xf32> to vector<32x128xf32>
    %83 = arith.mulf %61, %82 : vector<32x128xf32>
    %84 = vector.broadcast %81 : vector<1x128xf32> to vector<32x128xf32>
    %85 = arith.addf %83, %84 : vector<32x128xf32>
    %cst_25 = arith.constant 0.000000e+00 : f32
    %86 = vector.broadcast %cst_25 : f32 to vector<32x128xf32>
    %87 = arith.maximumf %85, %86 : vector<32x128xf32>
    %88 = arith.truncf %87 : vector<32x128xf32> to vector<32x128xbf16>
    %c0_26 = arith.constant 0 : index
    %c0_27 = arith.constant 0 : index
    %89 = vector.load %arg4[%c0_26, %c0_27] : memref<128x128xbf16, #tpu.memory_space<vmem>>, vector<128x128xbf16>
    %cst_28 = arith.constant dense<0.000000e+00> : vector<32x128xf32>
    %90 = tpu.matmul %88, %89, %cst_28 {dimension_numbers = #tpu.dot_dimension_numbers<[1], [0], [0], [1], [0, 0, 1, 1], [], []>} : vector<32x128xbf16>, vector<128x128xbf16>, vector<32x128xf32> -> vector<32x128xf32>
    %91 = arith.mulf %90, %90 : vector<32x128xf32>
    %92 = tpu.concatenate %90, %91 in 1 : vector<32x128xf32>, vector<32x128xf32> -> vector<32x256xf32>
    %cst_29 = arith.constant dense<0.000000e+00> : vector<256xf32>
    %93 = vector.multi_reduction <add>, %92, %cst_29 [0] : vector<32x256xf32> to vector<256xf32>
    %94 = vector.shape_cast %93 : vector<256xf32> to vector<1x256xf32>
    %cst_30 = arith.constant 3.200000e+01 : f32
    %95 = vector.broadcast %cst_30 : f32 to vector<1x256xf32>
    %96 = arith.divf %94, %95 : vector<1x256xf32>
    %97 = vector.extract_strided_slice %96 {offsets = [0, 0], sizes = [1, 128], strides = [1, 1]} : vector<1x256xf32> to vector<1x128xf32>
    %98 = vector.extract_strided_slice %96 {offsets = [0, 128], sizes = [1, 128], strides = [1, 1]} : vector<1x256xf32> to vector<1x128xf32>
    %99 = arith.mulf %97, %97 : vector<1x128xf32>
    %100 = arith.subf %98, %99 : vector<1x128xf32>
    %cst_31 = arith.constant 0.000000e+00 : f32
    %101 = vector.broadcast %cst_31 : f32 to vector<1x128xf32>
    %102 = arith.maximumf %100, %101 : vector<1x128xf32>
    %103 = vector.extract_strided_slice %0 {offsets = [3, 0], sizes = [1, 128], strides = [1, 1]} : vector<16x128xf32> to vector<1x128xf32>
    %cst_32 = arith.constant 9.99999974E-6 : f32
    %104 = vector.broadcast %cst_32 : f32 to vector<1x128xf32>
    %105 = arith.addf %102, %104 : vector<1x128xf32>
    %106 = math.rsqrt %105 : vector<1x128xf32>
    %107 = arith.mulf %103, %106 : vector<1x128xf32>
    %108 = vector.extract_strided_slice %0 {offsets = [7, 0], sizes = [1, 128], strides = [1, 1]} : vector<16x128xf32> to vector<1x128xf32>
    %109 = arith.mulf %97, %107 : vector<1x128xf32>
    %110 = arith.subf %108, %109 : vector<1x128xf32>
    %111 = vector.broadcast %107 : vector<1x128xf32> to vector<32x128xf32>
    %112 = arith.mulf %90, %111 : vector<32x128xf32>
    %113 = vector.broadcast %110 : vector<1x128xf32> to vector<32x128xf32>
    %114 = arith.addf %112, %113 : vector<32x128xf32>
    %cst_33 = arith.constant 0.000000e+00 : f32
    %115 = vector.broadcast %cst_33 : f32 to vector<32x128xf32>
    %116 = arith.maximumf %114, %115 : vector<32x128xf32>
    %117 = arith.truncf %116 : vector<32x128xf32> to vector<32x128xbf16>
    %c0_34 = arith.constant 0 : index
    %c0_35 = arith.constant 0 : index
    %118 = vector.load %arg5[%c0_34, %c0_35] : memref<128x128xbf16, #tpu.memory_space<vmem>>, vector<128x128xbf16>
    %cst_36 = arith.constant dense<0.000000e+00> : vector<32x128xf32>
    %119 = tpu.matmul %117, %118, %cst_36 {dimension_numbers = #tpu.dot_dimension_numbers<[1], [0], [0], [1], [0, 0, 1, 1], [], []>} : vector<32x128xbf16>, vector<128x128xbf16>, vector<32x128xf32> -> vector<32x128xf32>
    %120 = vector.extract_strided_slice %0 {offsets = [8, 0], sizes = [1, 128], strides = [1, 1]} : vector<16x128xf32> to vector<1x128xf32>
    %121 = vector.broadcast %120 : vector<1x128xf32> to vector<32x128xf32>
    %122 = arith.addf %119, %121 : vector<32x128xf32>
    %c0_37 = arith.constant 0 : index
    %c0_38 = arith.constant 0 : index
    %123 = vector.load %arg7[%c0_37, %c0_38] : memref<32x128xf32, #tpu.memory_space<vmem>>, vector<32x128xf32>
    tpu.vector_store %arg7[%c0_37, %c0_38], %122 {strides = array<i32>} : memref<32x128xf32, #tpu.memory_space<vmem>>, vector<32x128xf32>,
    return
  }
}

</mosaic_0001>

<bundles_post_ra>
// kernel: tpu_custom_call.1
= control target key start
LH: loop header
LB: loop body
LE: loop exit
PB: predicated region body
PF: predicated region fallthrough
CT: control target
= control target key end

     0   :  { %12 = vsyncpa [#allocation3], 0  ;;  %s1440_s0 = inlined_call_operand.hbm [shape: bf16[32,32], index: 0, kind: input, shape index: {}]   ;;  %s1441_s1 = inlined_call_operand.hbm [shape: bf16[32,128], index: 1, kind: input, shape index: {}]   ;;  %s1442_s2 = inlined_call_operand.hbm [shape: bf16[128,128], index: 2, kind: input, shape index: {}]   ;;  %s1443_s3 = inlined_call_operand.hbm [shape: bf16[128,128], index: 3, kind: input, shape index: {}]   ;;  %s1444_s4 = inlined_call_operand.hbm [shape: bf16[128,128], index: 4, kind: input, shape index: {}]   ;;  %s1445_s5 = inlined_call_operand.hbm [shape: bf16[128,128], index: 5, kind: input, shape index: {}]   ;;  %s1446_s6 = inlined_call_operand.hbm [shape: f32[16,128], index: 6, kind: input, shape index: {}]   ;;  %s1447_s7 = inlined_call_operand.hbm [shape: f32[32,128], index: 7, kind: output, shape index: {}]  }
   0x1   :  { %13 = vsyncpa [#allocation6], 0 }
   0x2   :  { %14 = vsyncpa [#allocation9], 0 }
   0x3   :  { %15 = vsyncpa [#allocation12], 0 }
   0x4   :  { %16 = vsyncpa [#allocation4], 0  ;;  %s1316_s24 = smov [#allocation5]   ;;  %s1317_s26 = smov [#allocation8]  }
   0x5   :  { %s34_s25 = sshll.u32 %s1316_s24, 4  ;;  %s58_s27 = sshll.u32 %s1317_s26, 4  ;;  %s35_s25 = int_to_ptr.vmem [resolvable:$true] %s34_s25  ;;  %s59_s27 = int_to_ptr.vmem [resolvable:$true] %s58_s27 }
   0x6   :  { %s1154_s28 = scalar_lea.vmem %s35_s25, 256  ;;  %p1159_p1 = scmp.lt.s32.totalorder %s35_s25, %s35_s25 }
   0x7   :  { %p1155_p0 = scmp.ne.s32.totalorder %s35_s25, %s1154_s28  ;;  %p1160_p2 = scmp.lt.s32.totalorder %s1154_s28, %s1154_s28 }
   0x9   :  { %p1161_p3 = por %p1160_p2, %p1159_p1 }
   0xb   :  { %p1162_p4 = pnand %p1161_p3, %p1155_p0 }
   0xd   :  { %1165 = shalt.err (!%p1162_p4)
}
   0xe   :  { %s1318_s29 = smov 64   ;;  %s1319_s30 = smov 4  }
   0xf   :  { %40 = dma.hbm_to_vmem [thread:$0]  %s1441_s1, 256, %s35_s25, [#allocation6], %s1318_s29, %s1318_s29, %s1319_s30  }
  0x10   :  { %s1174_s10 = scalar_lea.vmem %s59_s27, 1024  ;;  %p1179_p6 = scmp.lt.s32.totalorder %s59_s27, %s59_s27 }
  0x11   :  { %p1175_p5 = scmp.ne.s32.totalorder %s59_s27, %s1174_s10  ;;  %p1180_p7 = scmp.lt.s32.totalorder %s1174_s10, %s1174_s10 }
  0x13   :  { %p1181_p8 = por %p1180_p7, %p1179_p6 }
  0x15   :  { %p1182_p9 = pnand %p1181_p8, %p1175_p5 }
  0x17   :  { %1185 = shalt.err (!%p1182_p9)
}
  0x18   :  { %64 = dma.hbm_to_vmem [thread:$0]  %s1443_s3, 1024, %s59_s27, [#allocation9], %s1318_s29, %s1318_s29, %s1319_s30  }
  0x19   :  { %s1320_s13 = smov [#allocation11]   ;;  %s1321_s15 = smov [#allocation2]  }
  0x1a   :  { %s82_s14 = sshll.u32 %s1320_s13, 4  ;;  %s22_s16 = sshll.u32 %s1321_s15, 4  ;;  %s83_s14 = int_to_ptr.vmem [resolvable:$true] %s82_s14  ;;  %s23_s16 = int_to_ptr.vmem [resolvable:$true] %s22_s16 }
  0x1b   :  { %s1194_s1 = scalar_lea.vmem %s83_s14, 1024  ;;  %p1199_p11 = scmp.lt.s32.totalorder %s83_s14, %s83_s14 }
  0x1c   :  { %p1195_p10 = scmp.ne.s32.totalorder %s83_s14, %s1194_s1  ;;  %p1200_p12 = scmp.lt.s32.totalorder %s1194_s1, %s1194_s1 }
  0x1e   :  { %p1201_p13 = por %p1200_p12, %p1199_p11 }
  0x20   :  { %p1202_p0 = pnand %p1201_p13, %p1195_p10 }
  0x22   :  { %1205 = shalt.err (!%p1202_p0)
}
  0x23   :  { %88 = dma.hbm_to_vmem [thread:$0]  %s1445_s5, 1024, %s83_s14, [#allocation12], %s1318_s29, %s1318_s29, %s1319_s30  }
  0x24   :  { %s1214_s3 = scalar_lea.vmem %s23_s16, 256  ;;  %p1219_p2 = scmp.lt.s32.totalorder %s23_s16, %s23_s16 }
  0x25   :  { %p1215_p1 = scmp.ne.s32.totalorder %s23_s16, %s1214_s3  ;;  %p1220_p3 = scmp.lt.s32.totalorder %s1214_s3, %s1214_s3 }
  0x27   :  { %p1221_p4 = por %p1220_p3, %p1219_p2 }
  0x29   :  { %p1222_p5 = pnand %p1221_p4, %p1215_p1 }
  0x2b   :  { %1225 = shalt.err (!%p1222_p5)
}
  0x2c   :  { %28 = dma.hbm_to_vmem [thread:$0]  %s1440_s0, 256, %s23_s16, [#allocation3], %s1318_s29, %s1318_s29, %s1319_s30  }
  0x2d   :  { %s1322_s21 = smov [#allocation7]   ;;  %s1323_s23 = smov [#allocation10]  }
  0x2e   :  { %s46_s22 = sshll.u32 %s1322_s21, 4  ;;  %s70_s24 = sshll.u32 %s1323_s23, 4  ;;  %s47_s22 = int_to_ptr.vmem [resolvable:$true] %s46_s22  ;;  %s71_s24 = int_to_ptr.vmem [resolvable:$true] %s70_s24 }
  0x2f   :  { %s1234_s5 = scalar_lea.vmem %s47_s22, 1024  ;;  %p1239_p7 = scmp.lt.s32.totalorder %s47_s22, %s47_s22 }
  0x30   :  { %p1235_p6 = scmp.ne.s32.totalorder %s47_s22, %s1234_s5  ;;  %p1240_p8 = scmp.lt.s32.totalorder %s1234_s5, %s1234_s5 }
  0x32   :  { %p1241_p9 = por %p1240_p8, %p1239_p7 }
  0x34   :  { %p1242_p10 = pnand %p1241_p9, %p1235_p6 }
  0x36   :  { %1245 = shalt.err (!%p1242_p10)
}
  0x37   :  { %52 = dma.hbm_to_vmem [thread:$0]  %s1442_s2, 1024, %s47_s22, [#allocation6], %s1318_s29, %s1318_s29, %s1319_s30  }
  0x38   :  { %s1254_s0 = scalar_lea.vmem %s71_s24, 1024  ;;  %p1259_p12 = scmp.lt.s32.totalorder %s71_s24, %s71_s24 }
  0x39   :  { %p1255_p11 = scmp.ne.s32.totalorder %s71_s24, %s1254_s0  ;;  %p1260_p13 = scmp.lt.s32.totalorder %s1254_s0, %s1254_s0 }
  0x3b   :  { %p1261_p0 = por %p1260_p13, %p1259_p12 }
  0x3d   :  { %p1262_p1 = pnand %p1261_p0, %p1255_p11 }
  0x3f   :  { %1265 = shalt.err (!%p1262_p1)
}
  0x40   :  { %76 = dma.hbm_to_vmem [thread:$0]  %s1444_s4, 1024, %s71_s24, [#allocation9], %s1318_s29, %s1318_s29, %s1319_s30  }
  0x41   :  { %s1324_s8 = smov [#allocation13]  }
  0x42   :  { %s94_s9 = sshll.u32 %s1324_s8, 4  ;;  %s95_s9 = int_to_ptr.vmem [resolvable:$true] %s94_s9 }
  0x43   :  { %s1274_s10 = scalar_lea.vmem %s95_s9, 256  ;;  %p1279_p3 = scmp.lt.s32.totalorder %s95_s9, %s95_s9 }
  0x44   :  { %p1275_p2 = scmp.ne.s32.totalorder %s95_s9, %s1274_s10  ;;  %p1280_p4 = scmp.lt.s32.totalorder %s1274_s10, %s1274_s10 }
  0x46   :  { %p1281_p5 = por %p1280_p4, %p1279_p3 }
  0x48   :  { %p1282_p6 = pnand %p1281_p5, %p1275_p2 }
  0x4a   :  { %1285 = shalt.err (!%p1282_p6)
}
  0x4b   :  { %s1325_s2 = smov 128   ;;  %s1326_s11 = smov 8  }
  0x4c   :  { %100 = dma.hbm_to_vmem [thread:$0]  %s1446_s6, 256, %s95_s9, [#allocation12], %s1325_s2, %s1325_s2, %s1326_s11  }
  0x4d   :  { %1306 = dma.done.wait [#allocation3], 256  }
  0x4e   :  { %1307 = vsyncadd [#allocation3], 4294967040 }
  0x4f   :  { %1308 = dma.done.wait [#allocation6], 1280  }
  0x50   :  { %1309 = vsyncadd [#allocation6], 4294966016 }
  0x51   :  { %1310 = dma.done.wait [#allocation9], 2048  }
  0x52   :  { %1311 = vsyncadd [#allocation9], 4294965248 }
  0x53   :  { %1312 = dma.done.wait [#allocation12], 1280  }
  0x54   :  { %1313 = vsyncadd [#allocation12], 4294966016  ;;  %v1102_v0 = vld [vmem:[#allocation5 + $0x8] sm:$0xff]   ;;  %v1103_v1 = vld [vmem:[#allocation5] sm:$0xff]   ;;  %vm155_vm0 = vcmask 261120   ;;  %v247_v44 = vlaneseq  ;;  %s1327_s4 = smov [#allocation14]  }
  0x55   :  { %1002 = vmatprep.subr.bf16.mxu0 %v1102_v0  ;;  %v1104_v2 = vld [vmem:[#allocation2] sm:$0xff]   ;;  %v1105_v3 = vld [vmem:[#allocation2 + $0x8] sm:$0xff]   ;;  %v1106_v4 = vld [vmem:[#allocation7 + $0x38] sm:$0xff]   ;;  %s905_s6 = sshll.u32 %s1327_s4, 4  ;;  %s906_s6 = int_to_ptr.vmem [resolvable:$true] %s905_s6 }
  0x56   :  { %1003 = vmatpush3.bf16.msra.mxu0 %v1102_v0  ;;  %1006 = vmatprep.mubr.msk.bf16.mxu0 %vm155_vm0, %v1104_v2  ;;  %v1107_v5 = vld [vmem:[#allocation7 + $0x30] sm:$0xff]   ;;  %v1108_v6 = vld [vmem:[#allocation7 + $0x28] sm:$0xff]   ;;  %v1109_v7 = vld [vmem:[#allocation7 + $0x20] sm:$0xff]   ;;  %v1410_v45 = vshrl.u32 %v247_v44, 7  ;;  %s1286_s29 = scalar_lea.vmem %s906_s6, 512  ;;  %p1291_p8 = scmp.lt.s32.totalorder %s906_s6, %s906_s6 }
  0x57   :  { %1004 = vmatprep.subr.bf16.mxu0 %v1103_v1  ;;  %1010 = vmatprep.subr.bf16.mxu1 %v1106_v4  ;;  %v1110_v8 = vld [vmem:[#allocation7 + $0x18] sm:$0xff]   ;;  %v1111_v9 = vld [vmem:[#allocation7 + $0x10] sm:$0xff]   ;;  %v1112_v10 = vld [vmem:[#allocation7 + $0x8] sm:$0xff]   ;;  %p1287_p7 = scmp.ne.s32.totalorder %s906_s6, %s1286_s29  ;;  %p1292_p9 = scmp.lt.s32.totalorder %s1286_s29, %s1286_s29 }
  0x58   :  { %1011 = vmatpush3.bf16.msra.mxu1 %v1106_v4  ;;  %v1113_v11 = vld [vmem:[#allocation7] sm:$0xff]   ;;  %v249_v48 = vsub.s32 0, %v1410_v45  ;;  %v257_v53 = vsub.s32 4, %v1410_v45 }
  0x59   :  { %1012 = vmatprep.subr.bf16.mxu1 %v1107_v5  ;;  %v1412_v46 = vld [vmem:[#allocation13] sm:$0xff]  ;;  %p1293_p10 = por %p1292_p9, %p1291_p8 }
  0x5a   :  { %1005 = vmatpush3.bf16.msra.mxu0 %v1103_v1 }
  0x5b   :  { %p1294_p11 = pnand %p1293_p10, %p1287_p7 }
  0x5c   :  { %1013 = vmatpush3.bf16.msra.mxu1 %v1107_v5 }
  0x5d   :  { %1007 = vmatmul.mubr.msk.bf16.vlgmr.msra.gmra.mxu0 %vm155_vm0, %v1105_v3  ;;  %1014 = vmatprep.subr.bf16.mxu1 %v1108_v6 }
  0x60   :  { %1015 = vmatpush3.bf16.msra.mxu1 %v1108_v6  ;;  %v1114_v6 = vld [vmem:[#allocation8 + $0x38] sm:$0xff]  }
  0x61   :  { %1016 = vmatprep.subr.bf16.mxu1 %v1109_v7  ;;  %1030 = vmatprep.subr.bf16.mxu0 %v1114_v6 }
  0x62   :  { %1031 = vmatpush3.bf16.msra.mxu0 %v1114_v6 }
  0x64   :  { %1017 = vmatpush3.bf16.msra.mxu1 %v1109_v7  ;;  %v1115_v7 = vld [vmem:[#allocation8 + $0x30] sm:$0xff]  }
  0x65   :  { %1018 = vmatprep.subr.bf16.mxu1 %v1110_v8  ;;  %1032 = vmatprep.subr.bf16.mxu0 %v1115_v7 }
  0x66   :  { %1033 = vmatpush3.bf16.msra.mxu0 %v1115_v7 }
  0x68   :  { %1019 = vmatpush3.bf16.msra.mxu1 %v1110_v8  ;;  %v1116_v8 = vld [vmem:[#allocation8 + $0x28] sm:$0xff]  }
  0x69   :  { %1020 = vmatprep.subr.bf16.mxu1 %v1111_v9  ;;  %1034 = vmatprep.subr.bf16.mxu0 %v1116_v8 }
  0x6a   :  { %1035 = vmatpush3.bf16.msra.mxu0 %v1116_v8  ;;  %v1122_v8 = vld [vmem:[#allocation10 + $0x38] sm:$0xff]  }
  0x6c   :  { %1021 = vmatpush3.bf16.msra.mxu1 %v1111_v9  ;;  %v1117_v9 = vld [vmem:[#allocation8 + $0x20] sm:$0xff]  }
  0x6d   :  { %1022 = vmatprep.subr.bf16.mxu1 %v1112_v10  ;;  %1036 = vmatprep.subr.bf16.mxu0 %v1117_v9 }
  0x6e   :  { %1037 = vmatpush3.bf16.msra.mxu0 %v1117_v9  ;;  %v1123_v9 = vld [vmem:[#allocation10 + $0x30] sm:$0xff]  }
  0x70   :  { %1023 = vmatpush3.bf16.msra.mxu1 %v1112_v10  ;;  %v1118_v10 = vld [vmem:[#allocation8 + $0x18] sm:$0xff]  }
  0x71   :  { %1024 = vmatprep.subr.bf16.mxu1 %v1113_v11  ;;  %1038 = vmatprep.subr.bf16.mxu0 %v1118_v10 }
  0x72   :  { %1039 = vmatpush3.bf16.msra.mxu0 %v1118_v10  ;;  %v1124_v10 = vld [vmem:[#allocation10 + $0x28] sm:$0xff]  }
  0x74   :  { %1025 = vmatpush3.bf16.msra.mxu1 %v1113_v11  ;;  %v1119_v11 = vld [vmem:[#allocation8 + $0x10] sm:$0xff]  }
  0x75   :  { %1040 = vmatprep.subr.bf16.mxu0 %v1119_v11  ;;  %1050 = vmatprep.subr.bf16.mxu1 %v1122_v8 }
  0x76   :  { %1041 = vmatpush3.bf16.msra.mxu0 %v1119_v11  ;;  %v1125_v11 = vld [vmem:[#allocation10 + $0x20] sm:$0xff]  }
 0x11d   :  { %v1008_v12 = vpop.f32.mrf.mxu0 }
 0x11e   :  { %v213_v19 = vmul.f32 %v1008_v12, %v1008_v12 }
 0x11f   :  { %v196_v13 = vpop.f32.mrf.mxu0 }
 0x120   :  { %v211_v16 = vmul.f32 %v196_v13, %v196_v13 }
 0x121   :  { %v1009_v14 = vpop.f32.mrf.mxu0 }
 0x122   :  { %v214_v22 = vmul.f32 %v1009_v14, %v1009_v14 }
 0x123   :  { %v199_v15 = vpop.f32.mrf.mxu0 }
 0x124   :  { %v212_v17 = vmul.f32 %v199_v15, %v199_v15  ;;  %v215_v18 = vadd.f32 %v199_v15, %v196_v13 }
 0x126   :  { %v216_v20 = vadd.f32 %v1008_v12, %v215_v18  ;;  %v224_v21 = vadd.f32 %v212_v17, %v211_v16 }
 0x128   :  { %v217_v23 = vadd.f32 %v1009_v14, %v216_v20  ;;  %v225_v24 = vadd.f32 %v224_v21, %v213_v19 }
 0x12a   :  { %v218_v25 = vrot.slane %v217_v23, 4  ;;  %v226_v26 = vadd.f32 %v225_v24, %v214_v22 }
 0x12c   :  { %v219_v27 = vadd.f32 %v218_v25, %v217_v23  ;;  %v227_v28 = vrot.slane %v226_v26, 4 }
 0x12e   :  { %v220_v29 = vrot.slane %v219_v27, 2  ;;  %v228_v30 = vadd.f32 %v227_v28, %v226_v26 }
 0x130   :  { %v221_v31 = vadd.f32 %v220_v29, %v219_v27  ;;  %v229_v32 = vrot.slane %v228_v30, 2 }
 0x132   :  { %v222_v33 = vrot.slane %v221_v31, 1  ;;  %v230_v34 = vadd.f32 %v229_v32, %v228_v30 }
 0x134   :  { %v223_v35 = vadd.f32 %v222_v33, %v221_v31  ;;  %v231_v36 = vrot.slane %v230_v34, 1 }
 0x136   :  { %v232_v37 = vadd.f32 %v231_v36, %v230_v34  ;;  %v234_v38 = vmul.f32 0.03125, %v223_v35 }
 0x138   :  { %v235_v39 = vmul.f32 0.03125, %v232_v37  ;;  %v236_v40 = vmul.f32 %v234_v38, %v234_v38 }
 0x13a   :  { %v237_v41 = vsub.f32 %v235_v39, %v236_v40 }
 0x13c   :  { %v238_v42 = vmax.f32 %v237_v41, 0.0 }
 0x13e   :  { %v239_v43 = vadd.f32 1e-05, %v238_v42 }
 0x140   :  { %1138 = vrsqrt.f32 %v239_v43 }
 0x14d   :  { %v1139_v47 = vpop.eup %1138 }
 0x14e   :  { %v241_v49 = vmul.f32 %v1139_v47, %v1412_v46 }
 0x150   :  { %v242_v50 = vmul.f32 %v241_v49, %v234_v38  ;;  %v250_v51 = vrot.slane %v241_v49, %v249_v48 }
 0x152   :  { %v244_v52 = vrot.slane %v242_v50, 4  ;;  %v252_v55 = vmul.f32 %v250_v51, %v199_v15  ;;  %v251_v56 = vmul.f32 %v250_v51, %v196_v13  ;;  %v253_v58 = vmul.f32 %v1008_v12, %v250_v51  ;;  %v1120_v12 = vld [vmem:[#allocation8 + $0x8] sm:$0xff]   ;;  %v1121_v13 = vld [vmem:[#allocation8] sm:$0xff]  }
 0x153   :  { %v254_v59 = vmul.f32 %v1009_v14, %v250_v51  ;;  %1042 = vmatprep.subr.bf16.mxu0 %v1120_v12  ;;  %v419_v50 = vsub.s32 1, %v1410_v45 }
 0x154   :  { %v246_v54 = vsub.f32 %v1412_v46, %v244_v52  ;;  %1043 = vmatpush3.bf16.msra.mxu0 %v1120_v12  ;;  %v1126_v12 = vld [vmem:[#allocation10 + $0x18] sm:$0xff]  }
 0x155   :  { %1044 = vmatprep.subr.bf16.mxu0 %v1121_v13 }
 0x156   :  { %v258_v57 = vrot.slane %v246_v54, %v257_v53 }
 0x158   :  { %v259_v60 = vadd.f32 %v258_v57, %v251_v56  ;;  %v260_v61 = vadd.f32 %v258_v57, %v252_v55  ;;  %v261_v62 = vadd.f32 %v258_v57, %v253_v58  ;;  %v262_v63 = vadd.f32 %v258_v57, %v254_v59  ;;  %1045 = vmatpush3.bf16.msra.mxu0 %v1121_v13  ;;  %v1127_v13 = vld [vmem:[#allocation10 + $0x10] sm:$0xff]  }
 0x159   :  { %v427_v55 = vsub.s32 5, %v1410_v45 }
 0x15a   :  { %v263_v0 = vmax.f32 %v259_v60, 0.0  ;;  %v264_v1 = vmax.f32 %v260_v61, 0.0  ;;  %v265_v2 = vmax.f32 %v261_v62, 0.0  ;;  %v266_v3 = vmax.f32 %v262_v63, 0.0 }
 0x15c   :  { %v267_v4 = vpack.c.bf16 %v264_v1, %v263_v0  ;;  %v268_v5 = vpack.c.bf16 %v266_v3, %v265_v2 }
 0x15e   :  { %1026 = vmatprep.mubr.bf16.mxu1 %v267_v4 }
 0x15f   :  { %1027 = vmatmul.mubr.bf16.vlgmr.msra.gmra.mxu1 %v268_v5 }
 0x160   :  { %1051 = vmatpush3.bf16.msra.mxu1 %v1122_v8 }
 0x161   :  { %1052 = vmatprep.subr.bf16.mxu1 %v1123_v9 }
 0x164   :  { %1053 = vmatpush3.bf16.msra.mxu1 %v1123_v9 }
 0x165   :  { %1054 = vmatprep.subr.bf16.mxu1 %v1124_v10 }
 0x168   :  { %1055 = vmatpush3.bf16.msra.mxu1 %v1124_v10  ;;  %v1130_v10 = vld [vmem:[#allocation11 + $0x38] sm:$0xff]  }
 0x169   :  { %1056 = vmatprep.subr.bf16.mxu1 %v1125_v11  ;;  %1070 = vmatprep.subr.bf16.mxu0 %v1130_v10 }
 0x16c   :  { %1057 = vmatpush3.bf16.msra.mxu1 %v1125_v11  ;;  %v1131_v11 = vld [vmem:[#allocation11 + $0x30] sm:$0xff]  }
 0x16d   :  { %1058 = vmatprep.subr.bf16.mxu1 %v1126_v12 }
 0x170   :  { %1059 = vmatpush3.bf16.msra.mxu1 %v1126_v12  ;;  %v1132_v12 = vld [vmem:[#allocation11 + $0x28] sm:$0xff]  }
 0x171   :  { %1060 = vmatprep.subr.bf16.mxu1 %v1127_v13 }
 0x174   :  { %1061 = vmatpush3.bf16.msra.mxu1 %v1127_v13  ;;  %v1133_v13 = vld [vmem:[#allocation11 + $0x20] sm:$0xff]  }
 0x21f   :  { %v1028_v14 = vpop.f32.mrf.mxu1 }
 0x220   :  { %v384_v21 = vmul.f32 %v1028_v14, %v1028_v14 }
 0x221   :  { %v367_v15 = vpop.f32.mrf.mxu1 }
 0x222   :  { %v382_v18 = vmul.f32 %v367_v15, %v367_v15 }
 0x223   :  { %v1029_v16 = vpop.f32.mrf.mxu1 }
 0x224   :  { %v385_v24 = vmul.f32 %v1029_v16, %v1029_v16 }
 0x225   :  { %v370_v17 = vpop.f32.mrf.mxu1 }
 0x226   :  { %v383_v19 = vmul.f32 %v370_v17, %v370_v17  ;;  %v386_v20 = vadd.f32 %v370_v17, %v367_v15 }
 0x228   :  { %v387_v22 = vadd.f32 %v1028_v14, %v386_v20  ;;  %v395_v23 = vadd.f32 %v383_v19, %v382_v18 }
 0x22a   :  { %v388_v25 = vadd.f32 %v1029_v16, %v387_v22  ;;  %v396_v26 = vadd.f32 %v395_v23, %v384_v21 }
 0x22c   :  { %v389_v27 = vrot.slane %v388_v25, 4  ;;  %v397_v28 = vadd.f32 %v396_v26, %v385_v24 }
 0x22e   :  { %v390_v29 = vadd.f32 %v389_v27, %v388_v25  ;;  %v398_v30 = vrot.slane %v397_v28, 4 }
 0x230   :  { %v391_v31 = vrot.slane %v390_v29, 2  ;;  %v399_v32 = vadd.f32 %v398_v30, %v397_v28 }
 0x232   :  { %v392_v33 = vadd.f32 %v391_v31, %v390_v29  ;;  %v400_v34 = vrot.slane %v399_v32, 2 }
 0x234   :  { %v393_v35 = vrot.slane %v392_v33, 1  ;;  %v401_v36 = vadd.f32 %v400_v34, %v399_v32 }
 0x236   :  { %v394_v37 = vadd.f32 %v393_v35, %v392_v33  ;;  %v402_v38 = vrot.slane %v401_v36, 1 }
 0x238   :  { %v403_v39 = vadd.f32 %v402_v38, %v401_v36  ;;  %v404_v40 = vmul.f32 0.03125, %v394_v37 }
 0x23a   :  { %v405_v41 = vmul.f32 0.03125, %v403_v39  ;;  %v406_v42 = vmul.f32 %v404_v40, %v404_v40 }
 0x23c   :  { %v407_v43 = vsub.f32 %v405_v41, %v406_v42 }
 0x23e   :  { %v408_v44 = vmax.f32 %v407_v43, 0.0 }
 0x240   :  { %v409_v47 = vadd.f32 1e-05, %v408_v44 }
 0x242   :  { %1140 = vrsqrt.f32 %v409_v47 }
 0x24f   :  { %v1141_v49 = vpop.eup %1140 }
 0x250   :  { %v411_v51 = vmul.f32 %v1141_v49, %v1412_v46 }
 0x252   :  { %v412_v52 = vmul.f32 %v411_v51, %v404_v40  ;;  %v420_v53 = vrot.slane %v411_v51, %v419_v50 }
 0x254   :  { %v414_v54 = vrot.slane %v412_v52, 4  ;;  %v422_v57 = vmul.f32 %v420_v53, %v370_v17  ;;  %v421_v59 = vmul.f32 %v420_v53, %v367_v15  ;;  %v423_v60 = vmul.f32 %v1028_v14, %v420_v53  ;;  %v1128_v14 = vld [vmem:[#allocation10 + $0x8] sm:$0xff]   ;;  %v1129_v15 = vld [vmem:[#allocation10] sm:$0xff]  }
 0x255   :  { %v424_v61 = vmul.f32 %v1029_v16, %v420_v53  ;;  %1062 = vmatprep.subr.bf16.mxu1 %v1128_v14  ;;  %v589_v52 = vsub.s32 2, %v1410_v45 }
 0x256   :  { %v416_v56 = vsub.f32 %v1412_v46, %v414_v54  ;;  %1063 = vmatpush3.bf16.msra.mxu1 %v1128_v14  ;;  %v1134_v14 = vld [vmem:[#allocation11 + $0x18] sm:$0xff]  }
 0x257   :  { %1064 = vmatprep.subr.bf16.mxu1 %v1129_v15 }
 0x258   :  { %v428_v58 = vrot.slane %v416_v56, %v427_v55 }
 0x25a   :  { %v430_v62 = vadd.f32 %v428_v58, %v422_v57  ;;  %v429_v63 = vadd.f32 %v428_v58, %v421_v59  ;;  %v431_v0 = vadd.f32 %v428_v58, %v423_v60  ;;  %v432_v1 = vadd.f32 %v428_v58, %v424_v61  ;;  %1065 = vmatpush3.bf16.msra.mxu1 %v1129_v15  ;;  %v1135_v15 = vld [vmem:[#allocation11 + $0x10] sm:$0xff]  }
 0x25b   :  { %v597_v57 = vsub.s32 6, %v1410_v45 }
 0x25c   :  { %v433_v2 = vmax.f32 %v429_v63, 0.0  ;;  %v434_v3 = vmax.f32 %v430_v62, 0.0  ;;  %v435_v4 = vmax.f32 %v431_v0, 0.0  ;;  %v436_v5 = vmax.f32 %v432_v1, 0.0 }
 0x25e   :  { %v437_v6 = vpack.c.bf16 %v434_v3, %v433_v2  ;;  %v438_v7 = vpack.c.bf16 %v436_v5, %v435_v4 }
 0x260   :  { %1046 = vmatprep.mubr.bf16.mxu0 %v437_v6 }
 0x261   :  { %1047 = vmatmul.mubr.bf16.vlgmr.msra.gmra.mxu0 %v438_v7 }
 0x262   :  { %1071 = vmatpush3.bf16.msra.mxu0 %v1130_v10 }
 0x263   :  { %1072 = vmatprep.subr.bf16.mxu0 %v1131_v11 }
 0x266   :  { %1073 = vmatpush3.bf16.msra.mxu0 %v1131_v11 }
 0x267   :  { %1074 = vmatprep.subr.bf16.mxu0 %v1132_v12 }
 0x26a   :  { %1075 = vmatpush3.bf16.msra.mxu0 %v1132_v12  ;;  %v124_v12 = vld [vmem:[#allocation13 + $0x8] sm:$0xff] }
 0x26b   :  { %1076 = vmatprep.subr.bf16.mxu0 %v1133_v13 }
 0x26e   :  { %1077 = vmatpush3.bf16.msra.mxu0 %v1133_v13 }
 0x26f   :  { %1078 = vmatprep.subr.bf16.mxu0 %v1134_v14 }
 0x272   :  { %1079 = vmatpush3.bf16.msra.mxu0 %v1134_v14 }
 0x273   :  { %1080 = vmatprep.subr.bf16.mxu0 %v1135_v15 }
 0x276   :  { %1081 = vmatpush3.bf16.msra.mxu0 %v1135_v15 }
 0x321   :  { %v1048_v16 = vpop.f32.mrf.mxu0 }
 0x322   :  { %v554_v23 = vmul.f32 %v1048_v16, %v1048_v16 }
 0x323   :  { %v537_v17 = vpop.f32.mrf.mxu0 }
 0x324   :  { %v552_v20 = vmul.f32 %v537_v17, %v537_v17 }
 0x325   :  { %v1049_v18 = vpop.f32.mrf.mxu0 }
 0x326   :  { %v555_v26 = vmul.f32 %v1049_v18, %v1049_v18 }
 0x327   :  { %v540_v19 = vpop.f32.mrf.mxu0 }
 0x328   :  { %v553_v21 = vmul.f32 %v540_v19, %v540_v19  ;;  %v556_v22 = vadd.f32 %v540_v19, %v537_v17 }
 0x32a   :  { %v557_v24 = vadd.f32 %v1048_v16, %v556_v22  ;;  %v565_v25 = vadd.f32 %v553_v21, %v552_v20 }
 0x32c   :  { %v558_v27 = vadd.f32 %v1049_v18, %v557_v24  ;;  %v566_v28 = vadd.f32 %v565_v25, %v554_v23 }
 0x32e   :  { %v559_v29 = vrot.slane %v558_v27, 4  ;;  %v567_v30 = vadd.f32 %v566_v28, %v555_v26 }
 0x330   :  { %v560_v31 = vadd.f32 %v559_v29, %v558_v27  ;;  %v568_v32 = vrot.slane %v567_v30, 4 }
 0x332   :  { %v561_v33 = vrot.slane %v560_v31, 2  ;;  %v569_v34 = vadd.f32 %v568_v32, %v567_v30 }
 0x334   :  { %v562_v35 = vadd.f32 %v561_v33, %v560_v31  ;;  %v570_v36 = vrot.slane %v569_v34, 2 }
 0x336   :  { %v563_v37 = vrot.slane %v562_v35, 1  ;;  %v571_v38 = vadd.f32 %v570_v36, %v569_v34 }
 0x338   :  { %v564_v39 = vadd.f32 %v563_v37, %v562_v35  ;;  %v572_v40 = vrot.slane %v571_v38, 1 }
 0x33a   :  { %v573_v41 = vadd.f32 %v572_v40, %v571_v38  ;;  %v574_v42 = vmul.f32 0.03125, %v564_v39 }
 0x33c   :  { %v575_v43 = vmul.f32 0.03125, %v573_v41  ;;  %v576_v44 = vmul.f32 %v574_v42, %v574_v42 }
 0x33e   :  { %v577_v47 = vsub.f32 %v575_v43, %v576_v44 }
 0x340   :  { %v578_v49 = vmax.f32 %v577_v47, 0.0 }
 0x342   :  { %v579_v50 = vadd.f32 1e-05, %v578_v49 }
 0x344   :  { %1142 = vrsqrt.f32 %v579_v50 }
 0x351   :  { %v1143_v51 = vpop.eup %1142 }
 0x352   :  { %v581_v53 = vmul.f32 %v1143_v51, %v1412_v46 }
 0x354   :  { %v582_v54 = vmul.f32 %v581_v53, %v574_v42  ;;  %v590_v55 = vrot.slane %v581_v53, %v589_v52 }
 0x356   :  { %v584_v56 = vrot.slane %v582_v54, 4  ;;  %v592_v59 = vmul.f32 %v590_v55, %v540_v19  ;;  %v591_v61 = vmul.f32 %v590_v55, %v537_v17  ;;  %v593_v62 = vmul.f32 %v1048_v16, %v590_v55  ;;  %v1136_v16 = vld [vmem:[#allocation11 + $0x8] sm:$0xff]   ;;  %v1137_v17 = vld [vmem:[#allocation11] sm:$0xff]  }
 0x357   :  { %v594_v63 = vmul.f32 %v1049_v18, %v590_v55  ;;  %1082 = vmatprep.subr.bf16.mxu0 %v1136_v16  ;;  %v759_v54 = vsub.s32 3, %v1410_v45 }
 0x358   :  { %v586_v58 = vsub.f32 %v1412_v46, %v584_v56  ;;  %1083 = vmatpush3.bf16.msra.mxu0 %v1136_v16 }
 0x359   :  { %1084 = vmatprep.subr.bf16.mxu0 %v1137_v17 }
 0x35a   :  { %v598_v60 = vrot.slane %v586_v58, %v597_v57 }
 0x35c   :  { %v600_v0 = vadd.f32 %v598_v60, %v592_v59  ;;  %v599_v1 = vadd.f32 %v598_v60, %v591_v61  ;;  %v601_v2 = vadd.f32 %v598_v60, %v593_v62  ;;  %v602_v3 = vadd.f32 %v598_v60, %v594_v63  ;;  %1085 = vmatpush3.bf16.msra.mxu0 %v1137_v17 }
 0x35d   :  { %v767_v59 = vsub.s32 7, %v1410_v45 }
 0x35e   :  { %v603_v4 = vmax.f32 %v599_v1, 0.0  ;;  %v604_v5 = vmax.f32 %v600_v0, 0.0  ;;  %v605_v6 = vmax.f32 %v601_v2, 0.0  ;;  %v606_v7 = vmax.f32 %v602_v3, 0.0 }
 0x360   :  { %v607_v8 = vpack.c.bf16 %v604_v5, %v603_v4  ;;  %v608_v9 = vpack.c.bf16 %v606_v7, %v605_v6 }
 0x362   :  { %1066 = vmatprep.mubr.bf16.mxu1 %v607_v8 }
 0x363   :  { %1067 = vmatmul.mubr.bf16.vlgmr.msra.gmra.mxu1 %v608_v9 }
 0x423   :  { %v1068_v18 = vpop.f32.mrf.mxu1 }
 0x424   :  { %v724_v25 = vmul.f32 %v1068_v18, %v1068_v18 }
 0x425   :  { %v707_v19 = vpop.f32.mrf.mxu1 }
 0x426   :  { %v722_v22 = vmul.f32 %v707_v19, %v707_v19 }
 0x427   :  { %v1069_v20 = vpop.f32.mrf.mxu1 }
 0x428   :  { %v725_v28 = vmul.f32 %v1069_v20, %v1069_v20 }
 0x429   :  { %v710_v21 = vpop.f32.mrf.mxu1 }
 0x42a   :  { %v723_v23 = vmul.f32 %v710_v21, %v710_v21  ;;  %v726_v24 = vadd.f32 %v710_v21, %v707_v19 }
 0x42c   :  { %v727_v26 = vadd.f32 %v1068_v18, %v726_v24  ;;  %v735_v27 = vadd.f32 %v723_v23, %v722_v22 }
 0x42e   :  { %v728_v29 = vadd.f32 %v1069_v20, %v727_v26  ;;  %v736_v30 = vadd.f32 %v735_v27, %v724_v25 }
 0x430   :  { %v729_v31 = vrot.slane %v728_v29, 4  ;;  %v737_v32 = vadd.f32 %v736_v30, %v725_v28 }
 0x432   :  { %v730_v33 = vadd.f32 %v729_v31, %v728_v29  ;;  %v738_v34 = vrot.slane %v737_v32, 4 }
 0x434   :  { %v731_v35 = vrot.slane %v730_v33, 2  ;;  %v739_v36 = vadd.f32 %v738_v34, %v737_v32 }
 0x436   :  { %v732_v37 = vadd.f32 %v731_v35, %v730_v33  ;;  %v740_v38 = vrot.slane %v739_v36, 2 }
 0x438   :  { %v733_v39 = vrot.slane %v732_v37, 1  ;;  %v741_v40 = vadd.f32 %v740_v38, %v739_v36 }
 0x43a   :  { %v734_v41 = vadd.f32 %v733_v39, %v732_v37  ;;  %v742_v42 = vrot.slane %v741_v40, 1 }
 0x43c   :  { %v743_v43 = vadd.f32 %v742_v42, %v741_v40  ;;  %v744_v44 = vmul.f32 0.03125, %v734_v41 }
 0x43e   :  { %v745_v47 = vmul.f32 0.03125, %v743_v43  ;;  %v746_v49 = vmul.f32 %v744_v44, %v744_v44 }
 0x440   :  { %v747_v50 = vsub.f32 %v745_v47, %v746_v49 }
 0x442   :  { %v748_v51 = vmax.f32 %v747_v50, 0.0 }
 0x444   :  { %v749_v52 = vadd.f32 1e-05, %v748_v51 }
 0x446   :  { %1144 = vrsqrt.f32 %v749_v52 }
 0x453   :  { %v1145_v53 = vpop.eup %1144 }
 0x454   :  { %v751_v55 = vmul.f32 %v1145_v53, %v1412_v46 }
 0x456   :  { %v752_v56 = vmul.f32 %v751_v55, %v744_v44  ;;  %v760_v57 = vrot.slane %v751_v55, %v759_v54 }
 0x458   :  { %v754_v58 = vrot.slane %v752_v56, 4  ;;  %v762_v61 = vmul.f32 %v760_v57, %v710_v21  ;;  %v761_v63 = vmul.f32 %v760_v57, %v707_v19  ;;  %v763_v0 = vmul.f32 %v1068_v18, %v760_v57 }
 0x459   :  { %v764_v1 = vmul.f32 %v1069_v20, %v760_v57 }
 0x45a   :  { %v756_v60 = vsub.f32 %v1412_v46, %v754_v58  ;;  %v798_v46 = vrot.slane %v124_v12, %v249_v48 }
 0x45c   :  { %v768_v62 = vrot.slane %v756_v60, %v767_v59 }
 0x45e   :  { %v770_v2 = vadd.f32 %v768_v62, %v762_v61  ;;  %v769_v3 = vadd.f32 %v768_v62, %v761_v63  ;;  %v771_v4 = vadd.f32 %v768_v62, %v763_v0  ;;  %v772_v5 = vadd.f32 %v768_v62, %v764_v1 }
 0x460   :  { %v774_v6 = vmax.f32 %v770_v2, 0.0  ;;  %v773_v7 = vmax.f32 %v769_v3, 0.0  ;;  %v775_v8 = vmax.f32 %v771_v4, 0.0  ;;  %v776_v9 = vmax.f32 %v772_v5, 0.0 }
 0x462   :  { %v777_v10 = vpack.c.bf16 %v774_v6, %v773_v7  ;;  %v778_v11 = vpack.c.bf16 %v776_v9, %v775_v8 }
 0x464   :  { %1086 = vmatprep.mubr.bf16.mxu0 %v777_v10 }
 0x465   :  { %1087 = vmatmul.mubr.bf16.vlgmr.msra.gmra.mxu0 %v778_v11 }
 0x525   :  { %v1088_v13 = vpop.f32.mrf.mxu0 }
 0x526   :  { %v890_v14 = vadd.f32 %v1088_v13, %v798_v46 }
 0x527   :  { %v881_v15 = vpop.f32.mrf.mxu0 }
 0x528   :  { %898 = vst [vmem:[#allocation14 + $0x10] sm:$0xff] %v890_v14  ;;  %v882_v16 = vadd.f32 %v881_v15, %v798_v46 }
 0x529   :  { %v1089_v17 = vpop.f32.mrf.mxu0 }
 0x52a   :  { %896 = vst [vmem:[#allocation14] sm:$0xff] %v882_v16  ;;  %v893_v18 = vadd.f32 %v1089_v17, %v798_v46 }
 0x52b   :  { %v884_v19 = vpop.f32.mrf.mxu0 }
 0x52c   :  { %899 = vst [vmem:[#allocation14 + $0x18] sm:$0xff] %v893_v18  ;;  %v885_v20 = vadd.f32 %v884_v19, %v798_v46 }
 0x52e   :  { %897 = vst [vmem:[#allocation14 + $0x8] sm:$0xff] %v885_v20 }
 0x52f   :  { %1297 = shalt.err (!%p1294_p11)
}
 0x530   :  { %911 = dma.vmem_to_hbm [thread:$0]  %s906_s6, 512, %s1447_s7, [#allocation4], %s1325_s2, %s1325_s2, %s1326_s11  }
 0x531   :  { %1314 = dma.done.wait [#allocation4], 512  }
 0x532   :  { %1315 = vsyncadd [#allocation4], 4294966784 }
 0x533   :  { %915 = vsyncpa [#allocation3], 1 }
 0x534   :  { %916 = vsyncpa [#allocation6], 1 }
 0x535   :  { %917 = vsyncpa [#allocation9], 1 }
 0x536   :  { %918 = vsyncpa [#allocation12], 1 }
 0x537   :  { %919 = vsyncpa [#allocation4], 1 }

</bundles_post_ra>
